<compile_context>
chip_gen: v7x
topology: tpu7x:2x2x1
jax: 0.10.0
libtpu: 0.0.40
codegen_flags: <defaults>
</compile_context>

<pallas_src>
import jax
import jax.numpy as jnp
from jax import lax
from jax.experimental import pallas as pl
from jax.experimental.pallas import tpu as pltpu

VOCAB = 69
HIDDEN = 32
SEQ = 8
BATCH = 2
BPAD = 8          # pad batch to one full sublane tile
VPAD = 128        # pad vocab / output dim to one full lane tile


def rnn_fused_kernel(ids_ref, slab_a_ref, slab_b_ref, out_ref):
    """Fused embedding+input-proj gather, tanh RNN recurrence, final FC.

    ids_ref    : (T*BPAD, 1) int32, time-major flattened (batch-padded) token ids
    slab_a_ref : (VPAD + H, H) f32  = [E_pad ; W_hh^T],  E = emb @ W_ih^T + b
    slab_b_ref : (H + 1, VPAD) f32  = [W_fc^T padded ; b_fc padded]
    out_ref    : (BPAD, VPAD) f32 padded logits
    """
    TB = ids_ref.shape[0]
    B, _ = out_ref.shape
    T = TB // B
    H = slab_a_ref.shape[1]
    VP = slab_a_ref.shape[0] - H

    # Zero-cost static views into the packed slabs.
    e_proj = slab_a_ref[:VP, :]          # (128, 32)  embedding already x W_ih^T + b
    whh_t = slab_a_ref[VP:, :]           # (32, 32)
    wfc_t = slab_b_ref[:H, :]            # (32, 128)
    bfc = slab_b_ref[H:H + 1, :]         # (1, 128)

    # --- Embedding gather + input projection as ONE one-hot MXU matmul ---
    ids = ids_ref[...]                                            # (TB, 1) int32
    col = lax.broadcasted_iota(jnp.int32, (TB, VP), 1)            # (TB, 128)
    one_hot = (col == ids).astype(jnp.float32)                    # (TB, 128)
    x_proj = jnp.dot(one_hot, e_proj,
                     preferred_element_type=jnp.float32)          # (TB, 32)

    # --- Recurrence: per step only h @ W_hh^T + add + tanh on the critical path ---
    h = jnp.zeros((B, H), dtype=jnp.float32)
    for t in range(T):  # static, fully unrolled (T = 8)
        x_t = x_proj[t * B:(t + 1) * B, :]                        # (8, 32), sublane-aligned
        h = jnp.tanh(x_t + jnp.dot(h, whh_t,
                                   preferred_element_type=jnp.float32))

    # --- Final FC on the last hidden state (unmasked lane/sublane-dense store) ---
    logits = jnp.dot(h, wfc_t, preferred_element_type=jnp.float32) + bfc
    out_ref[...] = logits.astype(out_ref.dtype)


def prepare_params(params):
    """One-time (off hot path) fold / pad / pack of all weights into 2 slabs."""
    emb = params["embedding"].astype(jnp.float32)       # (V, H)
    w_ih = params["w_ih"].astype(jnp.float32)            # (H, H)
    w_hh = params["w_hh"].astype(jnp.float32)            # (H, H)
    b = (params["b_ih"] + params["b_hh"]).astype(jnp.float32)  # (H,)
    w_fc = params["w_fc"].astype(jnp.float32)            # (V, H)
    b_fc = params["b_fc"].astype(jnp.float32)            # (V,)

    V, H = emb.shape

    # Fold input projection + merged bias into the embedding table (parameter-only).
    e_proj = emb @ w_ih.T + b[None, :]                                  # (V, H)
    e_proj_pad = jnp.zeros((VPAD, H), jnp.float32).at[:V, :].set(e_proj)
    slab_a = jnp.concatenate([e_proj_pad, w_hh.T], axis=0)              # (VPAD+H, H)

    wfc_t_pad = jnp.zeros((H, VPAD), jnp.float32).at[:, :V].set(w_fc.T)
    bfc_pad = jnp.zeros((1, VPAD), jnp.float32).at[:, :V].set(b_fc[None, :])
    slab_b = jnp.concatenate([wfc_t_pad, bfc_pad], axis=0)              # (H+1, VPAD)

    return jax.device_put(slab_a), jax.device_put(slab_b)


def simple_rnn_forward(x_ids, slab_a, slab_b):
    """x_ids: (B, T) int32 token ids -> logits (B, VOCAB) float32."""
    B, T = x_ids.shape
    H = slab_a.shape[1]
    VP = slab_a.shape[0] - H

    # Tiny per-call glue only: pad batch to a sublane tile, go time-major.
    x_pad = jnp.zeros((BPAD, T), jnp.int32).at[:B, :].set(x_ids.astype(jnp.int32))
    ids_tm = jnp.transpose(x_pad, (1, 0)).reshape(T * BPAD, 1)

    flops = (2 * T * BPAD * VP * H          # one-hot gather+proj matmul
             + T * 2 * BPAD * H * H         # recurrence
             + 2 * BPAD * H * VP)           # final FC
    bytes_accessed = 4 * (ids_tm.size + slab_a.size + slab_b.size + BPAD * VP)

    vmem = pl.BlockSpec(memory_space=pltpu.MemorySpace.VMEM)
    out_pad = pl.pallas_call(
        rnn_fused_kernel,
        out_shape=jax.ShapeDtypeStruct((BPAD, VP), jnp.float32),
        in_specs=[vmem, vmem, vmem],
        out_specs=vmem,
        cost_estimate=pl.CostEstimate(
            flops=flops,
            transcendentals=T * BPAD * H,
            bytes_accessed=bytes_accessed,
        ),
        # Single-shot whole-array VMEM (~45 KB): no grid / pipelining; do NOT
        # shard across v7x TensorCores at this size (grid step overhead > work).
    )(ids_tm, slab_a, slab_b)
    return out_pad[:B, :VOCAB]


def reference_forward(x_ids, params):
    """Pure-JAX reference mirroring the PyTorch module semantics."""
    emb = jnp.take(params["embedding"], x_ids, axis=0)  # (B, T, H)
    B, T, H = emb.shape
    h = jnp.zeros((B, H), jnp.float32)
    for t in range(T):
        h = jnp.tanh(
            emb[:, t, :] @ params["w_ih"].T
            + params["b_ih"]
            + h @ params["w_hh"].T
            + params["b_hh"]
        )
    return h @ params["w_fc"].T + params["b_fc"]


def init_params(key):
    ks = jax.random.split(key, 7)
    scale = 1.0 / jnp.sqrt(HIDDEN)
    return {
        "embedding": jax.random.normal(ks[0], (VOCAB, HIDDEN), jnp.float32),
        "w_ih": jax.random.uniform(ks[1], (HIDDEN, HIDDEN), jnp.float32, -scale, scale),
        "w_hh": jax.random.uniform(ks[2], (HIDDEN, HIDDEN), jnp.float32, -scale, scale),
        "b_ih": jax.random.uniform(ks[3], (HIDDEN,), jnp.float32, -scale, scale),
        "b_hh": jax.random.uniform(ks[4], (HIDDEN,), jnp.float32, -scale, scale),
        "w_fc": jax.random.uniform(ks[5], (VOCAB, HIDDEN), jnp.float32, -scale, scale),
        "b_fc": jax.random.uniform(ks[6], (VOCAB,), jnp.float32, -scale, scale),
    }


if __name__ == "__main__":
    key = jax.random.PRNGKey(0)
    k_param, k_x = jax.random.split(key)
    params = init_params(k_param)
    x_ids = jax.random.randint(k_x, (BATCH, SEQ), 0, VOCAB, dtype=jnp.int32)

    # One-time weight prep (folding / padding / slab packing) off the hot path.
    slab_a, slab_b = prepare_params(params)

    forward = jax.jit(simple_rnn_forward)
    logits = forward(x_ids, slab_a, slab_b)
    logits = jax.block_until_ready(logits)

    ref = reference_forward(x_ids, params)
    assert logits.shape == (BATCH, VOCAB)
    assert jnp.allclose(logits, ref, atol=1e-4, rtol=1e-4), "mismatch vs reference"

    print("KERNEL_OK")
</pallas_src>

<mosaic_0001>
module attributes {stable_mosaic.version = 11 : i64} {
  func.func @rnn_fused_kernel(%arg0: memref<64x1xi32, #tpu.memory_space<vmem>>, %arg1: memref<160x32xf32, #tpu.memory_space<vmem>>, %arg2: memref<33x128xf32, #tpu.memory_space<vmem>>, %arg3: memref<8x128xf32, #tpu.memory_space<vmem>>) attributes {dimension_semantics = [], scalar_prefetch = 0 : i64, scratch_operands = 0 : i64, tpu.core_type = #tpu.core_type<tc>} {
    %c0 = arith.constant 0 : index
    %c0_0 = arith.constant 0 : index
    %0 = vector.load %arg1[%c0, %c0_0] : memref<160x32xf32, #tpu.memory_space<vmem>>, vector<128x32xf32>
    %c128 = arith.constant 128 : index
    %c0_1 = arith.constant 0 : index
    %1 = vector.load %arg1[%c128, %c0_1] : memref<160x32xf32, #tpu.memory_space<vmem>>, vector<32x32xf32>
    %c0_2 = arith.constant 0 : index
    %c0_3 = arith.constant 0 : index
    %2 = vector.load %arg2[%c0_2, %c0_3] : memref<33x128xf32, #tpu.memory_space<vmem>>, vector<32x128xf32>
    %c32 = arith.constant 32 : index
    %c0_4 = arith.constant 0 : index
    %3 = vector.load %arg2[%c32, %c0_4] : memref<33x128xf32, #tpu.memory_space<vmem>>, vector<1x128xf32>
    %c0_5 = arith.constant 0 : index
    %c0_6 = arith.constant 0 : index
    %4 = vector.load %arg0[%c0_5, %c0_6] : memref<64x1xi32, #tpu.memory_space<vmem>>, vector<64x1xi32>
    %5 = tpu.iota {dimensions = array<i32: 1>} : vector<64x128xi32>
    %6 = vector.broadcast %4 : vector<64x1xi32> to vector<64x128xi32>
    %7 = arith.cmpi eq, %5, %6 : vector<64x128xi32>
    %8 = arith.extui %7 : vector<64x128xi1> to vector<64x128xi32>
    %9 = arith.sitofp %8 : vector<64x128xi32> to vector<64x128xf32>
    %cst = arith.constant dense<0.000000e+00> : vector<64x32xf32>
    %10 = tpu.matmul %9, %0, %cst {dimension_numbers = #tpu.dot_dimension_numbers<[1], [0], [0], [1], [0, 0, 1, 1], [], []>} : vector<64x128xf32>, vector<128x32xf32>, vector<64x32xf32> -> vector<64x32xf32>
    %cst_7 = arith.constant 0.000000e+00 : f32
    %11 = vector.broadcast %cst_7 : f32 to vector<8x32xf32>
    %12 = vector.extract_strided_slice %10 {offsets = [0, 0], sizes = [8, 32], strides = [1, 1]} : vector<64x32xf32> to vector<8x32xf32>
    %cst_8 = arith.constant dense<0.000000e+00> : vector<8x32xf32>
    %13 = tpu.matmul %11, %1, %cst_8 {dimension_numbers = #tpu.dot_dimension_numbers<[1], [0], [0], [1], [0, 0, 1, 1], [], []>} : vector<8x32xf32>, vector<32x32xf32>, vector<8x32xf32> -> vector<8x32xf32>
    %14 = arith.addf %12, %13 : vector<8x32xf32>
    %15 = math.tanh %14 : vector<8x32xf32>
    %16 = vector.extract_strided_slice %10 {offsets = [8, 0], sizes = [8, 32], strides = [1, 1]} : vector<64x32xf32> to vector<8x32xf32>
    %cst_9 = arith.constant dense<0.000000e+00> : vector<8x32xf32>
    %17 = tpu.matmul %15, %1, %cst_9 {dimension_numbers = #tpu.dot_dimension_numbers<[1], [0], [0], [1], [0, 0, 1, 1], [], []>} : vector<8x32xf32>, vector<32x32xf32>, vector<8x32xf32> -> vector<8x32xf32>
    %18 = arith.addf %16, %17 : vector<8x32xf32>
    %19 = math.tanh %18 : vector<8x32xf32>
    %20 = vector.extract_strided_slice %10 {offsets = [16, 0], sizes = [8, 32], strides = [1, 1]} : vector<64x32xf32> to vector<8x32xf32>
    %cst_10 = arith.constant dense<0.000000e+00> : vector<8x32xf32>
    %21 = tpu.matmul %19, %1, %cst_10 {dimension_numbers = #tpu.dot_dimension_numbers<[1], [0], [0], [1], [0, 0, 1, 1], [], []>} : vector<8x32xf32>, vector<32x32xf32>, vector<8x32xf32> -> vector<8x32xf32>
    %22 = arith.addf %20, %21 : vector<8x32xf32>
    %23 = math.tanh %22 : vector<8x32xf32>
    %24 = vector.extract_strided_slice %10 {offsets = [24, 0], sizes = [8, 32], strides = [1, 1]} : vector<64x32xf32> to vector<8x32xf32>
    %cst_11 = arith.constant dense<0.000000e+00> : vector<8x32xf32>
    %25 = tpu.matmul %23, %1, %cst_11 {dimension_numbers = #tpu.dot_dimension_numbers<[1], [0], [0], [1], [0, 0, 1, 1], [], []>} : vector<8x32xf32>, vector<32x32xf32>, vector<8x32xf32> -> vector<8x32xf32>
    %26 = arith.addf %24, %25 : vector<8x32xf32>
    %27 = math.tanh %26 : vector<8x32xf32>
    %28 = vector.extract_strided_slice %10 {offsets = [32, 0], sizes = [8, 32], strides = [1, 1]} : vector<64x32xf32> to vector<8x32xf32>
    %cst_12 = arith.constant dense<0.000000e+00> : vector<8x32xf32>
    %29 = tpu.matmul %27, %1, %cst_12 {dimension_numbers = #tpu.dot_dimension_numbers<[1], [0], [0], [1], [0, 0, 1, 1], [], []>} : vector<8x32xf32>, vector<32x32xf32>, vector<8x32xf32> -> vector<8x32xf32>
    %30 = arith.addf %28, %29 : vector<8x32xf32>
    %31 = math.tanh %30 : vector<8x32xf32>
    %32 = vector.extract_strided_slice %10 {offsets = [40, 0], sizes = [8, 32], strides = [1, 1]} : vector<64x32xf32> to vector<8x32xf32>
    %cst_13 = arith.constant dense<0.000000e+00> : vector<8x32xf32>
    %33 = tpu.matmul %31, %1, %cst_13 {dimension_numbers = #tpu.dot_dimension_numbers<[1], [0], [0], [1], [0, 0, 1, 1], [], []>} : vector<8x32xf32>, vector<32x32xf32>, vector<8x32xf32> -> vector<8x32xf32>
    %34 = arith.addf %32, %33 : vector<8x32xf32>
    %35 = math.tanh %34 : vector<8x32xf32>
    %36 = vector.extract_strided_slice %10 {offsets = [48, 0], sizes = [8, 32], strides = [1, 1]} : vector<64x32xf32> to vector<8x32xf32>
    %cst_14 = arith.constant dense<0.000000e+00> : vector<8x32xf32>
    %37 = tpu.matmul %35, %1, %cst_14 {dimension_numbers = #tpu.dot_dimension_numbers<[1], [0], [0], [1], [0, 0, 1, 1], [], []>} : vector<8x32xf32>, vector<32x32xf32>, vector<8x32xf32> -> vector<8x32xf32>
    %38 = arith.addf %36, %37 : vector<8x32xf32>
    %39 = math.tanh %38 : vector<8x32xf32>
    %40 = vector.extract_strided_slice %10 {offsets = [56, 0], sizes = [8, 32], strides = [1, 1]} : vector<64x32xf32> to vector<8x32xf32>
    %cst_15 = arith.constant dense<0.000000e+00> : vector<8x32xf32>
    %41 = tpu.matmul %39, %1, %cst_15 {dimension_numbers = #tpu.dot_dimension_numbers<[1], [0], [0], [1], [0, 0, 1, 1], [], []>} : vector<8x32xf32>, vector<32x32xf32>, vector<8x32xf32> -> vector<8x32xf32>
    %42 = arith.addf %40, %41 : vector<8x32xf32>
    %43 = math.tanh %42 : vector<8x32xf32>
    %cst_16 = arith.constant dense<0.000000e+00> : vector<8x128xf32>
    %44 = tpu.matmul %43, %2, %cst_16 {dimension_numbers = #tpu.dot_dimension_numbers<[1], [0], [0], [1], [0, 0, 1, 1], [], []>} : vector<8x32xf32>, vector<32x128xf32>, vector<8x128xf32> -> vector<8x128xf32>
    %45 = vector.broadcast %3 : vector<1x128xf32> to vector<8x128xf32>
    %46 = arith.addf %44, %45 : vector<8x128xf32>
    %c0_17 = arith.constant 0 : index
    %c0_18 = arith.constant 0 : index
    %47 = vector.load %arg3[%c0_17, %c0_18] : memref<8x128xf32, #tpu.memory_space<vmem>>, vector<8x128xf32>
    tpu.vector_store %arg3[%c0_17, %c0_18], %46 {strides = array<i32>} : memref<8x128xf32, #tpu.memory_space<vmem>>, vector<8x128xf32>,
    return
  }
}

</mosaic_0001>

<bundles_post_ra>
// kernel: simple_rnn_forward.1
= control target key start
LH: loop header
LB: loop body
LE: loop exit
PB: predicated region body
PF: predicated region fallthrough
CT: control target
= control target key end

     0   :  { %v1231_v0 = vmov 0   ;;  %v1232_v7 = vmov 0.0|0.0   ;;  %vm1233_vm0 = vmmov 0   ;;  %v1234_v16 = vmov 0.0   ;;  %s1423_s0 = inlined_call_operand.vmem [shape: s32[64,1], index: 0, kind: input, shape index: {}]   ;;  %s1424_s1 = inlined_call_operand.vmem [shape: f32[160,32], index: 1, kind: input, shape index: {}]   ;;  %s1425_s2 = inlined_call_operand.vmem [shape: f32[33,128], index: 2, kind: input, shape index: {}]   ;;  %s1426_s3 = inlined_call_operand.vmem [shape: f32[8,128], index: 3, kind: output, shape index: {}]  }
   0x1   :  { %1213 = vset.pattern.permute.xlu0 %v1231_v0  ;;  %v39_v1 = vld [vmem:[%s1423_s0] sm:$0xff]  ;;  %1214 = vset.pattern.permute.xlu1 %v1231_v0  ;;  %v41_v2 = vld [vmem:[%s1423_s0 + $0x10] sm:$0xff]  ;;  %v40_v3 = vld [vmem:[%s1423_s0 + $0x8] sm:$0xff]  ;;  %v47_v40 = vlaneseq  ;;  %v1235_v44 = vmov 1.0   ;;  %vm202_vm8 = vcmask 261120  }
   0x2   :  { %50 = vperm.xlu0 %1213, %v39_v1   ;;  %56 = vperm.xlu1 %1214, %v41_v2   ;;  %v42_v4 = vld [vmem:[%s1423_s0 + $0x18] sm:$0xff]  ;;  %v14_v5 = vld [vmem:[%s1424_s1] sm:$0xff]  ;;  %v15_v6 = vld [vmem:[%s1424_s1 + $0x8] sm:$0xff] }
   0x3   :  { %1154 = vmatprep.subr.bf16.mxu1 %v1232_v7  ;;  %v1122_v8 = vpack.c.bf16 %v15_v6, %v14_v5  ;;  %v16_v9 = vld [vmem:[%s1424_s1 + $0x10] sm:$0xff]  ;;  %v17_v10 = vld [vmem:[%s1424_s1 + $0x18] sm:$0xff]  ;;  %v18_v12 = vld [vmem:[%s1424_s1 + $0x20] sm:$0xff]  ;;  %1031 = vmatprep.mubr.msk.f32.mxu1 %vm1233_vm0, %v1234_v16  ;;  %v48_v41 = vand.u32 127, %v47_v40 }
   0x4   :  { %v1126_v11 = vpack.c.bf16 %v17_v10, %v16_v9  ;;  %v19_v13 = vld [vmem:[%s1424_s1 + $0x28] sm:$0xff]  ;;  %v43_v14 = vld [vmem:[%s1423_s0 + $0x20] sm:$0xff]  ;;  %v32_v21 = vld [vmem:[%s1424_s1 + $0x90] sm:$0xff] }
   0x5   :  { %v44_v15 = vld [vmem:[%s1423_s0 + $0x28] sm:$0xff]  ;;  %1123 = vmatprep.subr.bf16.mxu0 %v1122_v8  ;;  %v30_v17 = vld [vmem:[%s1424_s1 + $0x80] sm:$0xff]  ;;  %v1130_v19 = vpack.c.bf16 %v19_v13, %v18_v12  ;;  %v33_v22 = vld [vmem:[%s1424_s1 + $0x98] sm:$0xff] }
   0x6   :  { %53 = vperm.xlu0 %1213, %v40_v3   ;;  %59 = vperm.xlu1 %1214, %v42_v4   ;;  %v31_v18 = vld [vmem:[%s1424_s1 + $0x88] sm:$0xff]  ;;  %v20_v23 = vld [vmem:[%s1424_s1 + $0x30] sm:$0xff]  ;;  %v21_v24 = vld [vmem:[%s1424_s1 + $0x38] sm:$0xff]  ;;  %v1319_v26 = vpack.c.bf16 %v33_v22, %v32_v21 }
   0x7   :  { %1125 = vmatpush3.bf16.msra.mxu0 %v1122_v8  ;;  %v1301_v20 = vpack.c.bf16 %v31_v18, %v30_v17  ;;  %v45_v25 = vld [vmem:[%s1423_s0 + $0x30] sm:$0xff]  ;;  %v1134_v27 = vpack.c.bf16 %v21_v24, %v20_v23  ;;  %v22_v28 = vld [vmem:[%s1424_s1 + $0x40] sm:$0xff]  ;;  %v23_v29 = vld [vmem:[%s1424_s1 + $0x48] sm:$0xff] }
   0x8   :  { %1127 = vmatprep.subr.bf16.mxu0 %v1126_v11  ;;  %v1138_v30 = vpack.c.bf16 %v23_v29, %v22_v28  ;;  %v24_v31 = vld [vmem:[%s1424_s1 + $0x50] sm:$0xff]  ;;  %v25_v32 = vld [vmem:[%s1424_s1 + $0x58] sm:$0xff]  ;;  %v26_v34 = vld [vmem:[%s1424_s1 + $0x60] sm:$0xff] }
   0x9   :  { %1156 = vmatpush3.bf16.msra.mxu1 %v1301_v20  ;;  %v1142_v33 = vpack.c.bf16 %v25_v32, %v24_v31  ;;  %v27_v35 = vld [vmem:[%s1424_s1 + $0x68] sm:$0xff]  ;;  %v28_v37 = vld [vmem:[%s1424_s1 + $0x70] sm:$0xff]  ;;  %v29_v38 = vld [vmem:[%s1424_s1 + $0x78] sm:$0xff] }
   0xa   :  { %62 = vperm.xlu0 %1213, %v43_v14   ;;  %65 = vperm.xlu1 %1214, %v44_v15   ;;  %v1146_v36 = vpack.c.bf16 %v27_v35, %v26_v34  ;;  %v1150_v39 = vpack.c.bf16 %v29_v38, %v28_v37  ;;  %v46_v52 = vld [vmem:[%s1423_s0 + $0x38] sm:$0xff]  ;;  %v36_v28 = vld [vmem:[%s1425_s2 + $0x10] sm:$0xff]  ;;  %v908_v35 = vld [vmem:[%s1425_s2 + $0x20] ss:$0 sm:$0xff] }
   0xb   :  { %1129 = vmatpush3.bf16.msra.mxu0 %v1126_v11  ;;  %1157 = vmatprep.subr.bf16.mxu1 %v1232_v7  ;;  %v37_v29 = vld [vmem:[%s1425_s2 + $0x18] sm:$0xff] }
   0xc   :  { %1131 = vmatprep.subr.bf16.mxu0 %v1130_v19 }
   0xd   :  { %1159 = vmatpush3.bf16.msra.mxu1 %v1319_v26 }
   0xe   :  { %68 = vperm.xlu0 %1213, %v45_v25   ;;  %1160 = vmatprep.subr.bf16.mxu1 %v1232_v7 }
   0xf   :  { %1133 = vmatpush3.bf16.msra.mxu0 %v1130_v19  ;;  %71 = vperm.xlu1 %1214, %v46_v52  }
  0x10   :  { %1135 = vmatprep.subr.bf16.mxu0 %v1134_v27  ;;  %1032 = vmatmul.mubr.f32.vlgmr.msra.gmra.mrb[0].mxu1 %v1234_v16 }
  0x11   :  { %1162 = vmatpush3.bf16.msra.mxu1 %v1301_v20  ;;  %1042 = vmatprep.mubr.msk.f32.mxu1 %vm1233_vm0, %v1234_v16 }
  0x12   :  { %1163 = vmatprep.subr.bf16.mxu1 %v1232_v7 }
  0x13   :  { %1137 = vmatpush3.bf16.msra.mxu0 %v1134_v27  ;;  %v35_v27 = vld [vmem:[%s1425_s2 + $0x8] sm:$0xff] }
  0x14   :  { %1139 = vmatprep.subr.bf16.mxu0 %v1138_v30 }
  0x15   :  { %1165 = vmatpush3.bf16.msra.mxu1 %v1319_v26 }
  0x16   :  { %1166 = vmatprep.subr.bf16.mxu1 %v1232_v7 }
  0x17   :  { %1141 = vmatpush3.bf16.msra.mxu0 %v1138_v30  ;;  %v1206_v30 = vpack.c.bf16 %v37_v29, %v36_v28 }
  0x18   :  { %1143 = vmatprep.subr.bf16.mxu0 %v1142_v33 }
  0x1b   :  { %1145 = vmatpush3.bf16.msra.mxu0 %v1142_v33 }
  0x1c   :  { %1147 = vmatprep.subr.bf16.mxu0 %v1146_v36 }
  0x1f   :  { %1149 = vmatpush3.bf16.msra.mxu0 %v1146_v36 }
  0x20   :  { %1151 = vmatprep.subr.bf16.mxu0 %v1150_v39 }
  0x23   :  { %1153 = vmatpush3.bf16.msra.mxu0 %v1150_v39 }
  0x24   :  { %1184 = vmatprep.subr.bf16.mxu0 %v1232_v7 }
  0x81   :  { %v51_v42 = vpop.permute.xlu0 %50  ;;  %v57_v43 = vpop.permute.xlu1 %56 }
  0x82   :  { %vm73_vm1 = vcmp.eq.s32.totalorder %v48_v41, %v51_v42  ;;  %vm75_vm2 = vcmp.eq.s32.totalorder %v48_v41, %v57_v43 }
  0x83   :  { %1011 = vmatprep.mubr.msk.f32.mxu0 %vm73_vm1, %v1235_v44 }
  0x85   :  { %v54_v45 = vpop.permute.xlu0 %53  ;;  %v60_v46 = vpop.permute.xlu1 %59 }
  0x86   :  { %vm74_vm3 = vcmp.eq.s32.totalorder %v48_v41, %v54_v45  ;;  %vm76_vm4 = vcmp.eq.s32.totalorder %v48_v41, %v60_v46 }
  0x87   :  { %1012 = vmatmul.mubr.msk.f32.vlgmr.msra.gmra.mrb[0].mxu0 %vm74_vm3, %v1235_v44 }
  0x88   :  { %1014 = vmatprep.mubr.msk.f32.mxu0 %vm75_vm2, %v1235_v44  ;;  %1186 = vmatpush3.bf16.msra.mxu0 %v1301_v20 }
  0x89   :  { %v63_v47 = vpop.permute.xlu0 %62  ;;  %v66_v48 = vpop.permute.xlu1 %65  ;;  %1187 = vmatprep.subr.bf16.mxu0 %v1232_v7 }
  0x8a   :  { %vm77_vm5 = vcmp.eq.s32.totalorder %v48_v41, %v63_v47  ;;  %vm78_vm6 = vcmp.eq.s32.totalorder %v48_v41, %v66_v48 }
  0x8b   :  { %1015 = vmatmul.mubr.msk.f32.gmra.mrb[2].mxu0 %vm76_vm4, %v1235_v44 }
  0x8c   :  { %1017 = vmatprep.mubr.msk.f32.mxu0 %vm77_vm5, %v1235_v44  ;;  %1189 = vmatpush3.bf16.msra.mxu0 %v1319_v26 }
  0x8d   :  { %v69_v49 = vpop.permute.xlu0 %68  ;;  %1196 = vmatprep.subr.bf16.mxu0 %v1232_v7 }
  0x8e   :  { %vm79_vm7 = vcmp.eq.s32.totalorder %v48_v41, %v69_v49  ;;  %v72_v57 = vpop.permute.xlu1 %71 }
  0x8f   :  { %1018 = vmatmul.mubr.msk.f32.gmra.mrb[4].mxu0 %vm78_vm6, %v1235_v44  ;;  %vm80_vm9 = vcmp.eq.s32.totalorder %v48_v41, %v72_v57 }
  0x90   :  { %1020 = vmatprep.mubr.msk.f32.mxu0 %vm79_vm7, %v1235_v44 }
  0x93   :  { %1021 = vmatmul.mubr.msk.f32.gmra.mrb[6].mxu0 %vm80_vm9, %v1235_v44 }
  0x94   :  { %1086 = vmatprep.mubr.msk.f32.mxu0 %vm1233_vm0, %v1234_v16 }
  0xe3   :  { %v272_v50 = vpop.f32.mrb[0].mxu1 }
  0xe4   :  { %v1033_v51 = vpop.f32.mrb[1].mxu1 }
 0x15a   :  { %v1013_v53 = vpop.f32.mrb[0].mxu0 }
 0x15b   :  { %v163_v54 = vpop.f32.mrb[1].mxu0 }
 0x15c   :  { %v276_v55 = vadd.f32 %v272_v50, %v163_v54 }
 0x15e   :  { %1215 = vtanh.f32 %v276_v55  ;;  %v1016_v58 = vpop.f32.mrb[2].mxu0 }
 0x15f   :  { %v173_v59 = vpop.f32.mrb[3].mxu0 }
 0x162   :  { %v1019_v60 = vpop.f32.mrb[4].mxu0 }
 0x163   :  { %v183_v61 = vpop.f32.mrb[5].mxu0 }
 0x166   :  { %v1022_v2 = vpop.f32.mrb[6].mxu0 }
 0x167   :  { %v193_v3 = vpop.f32.mrb[7].mxu0 }
 0x168   :  { %v1216_v56 = vpop.eup %1215 }
 0x169   :  { %1043 = vmatmul.mubr.msk.f32.vlgmr.msra.gmra.mrb[2].mxu1 %vm202_vm8, %v1216_v56 }
 0x16a   :  { %1168 = vmatpush3.bf16.msra.mxu1 %v1301_v20  ;;  %1053 = vmatprep.mubr.msk.f32.mxu1 %vm1233_vm0, %v1234_v16 }
 0x16b   :  { %1169 = vmatprep.subr.bf16.mxu1 %v1232_v7 }
 0x16e   :  { %1171 = vmatpush3.bf16.msra.mxu1 %v1319_v26 }
 0x16f   :  { %1172 = vmatprep.subr.bf16.mxu1 %v1232_v7 }
 0x23c   :  { %v347_v62 = vpop.f32.mrb[2].mxu1 }
 0x23d   :  { %v351_v63 = vadd.f32 %v1013_v53, %v347_v62  ;;  %v1044_v0 = vpop.f32.mrb[3].mxu1 }
 0x23f   :  { %1217 = vtanh.f32 %v351_v63 }
 0x249   :  { %v1218_v1 = vpop.eup %1217 }
 0x24a   :  { %1054 = vmatmul.mubr.msk.f32.vlgmr.msra.gmra.mrb[4].mxu1 %vm202_vm8, %v1218_v1 }
 0x24b   :  { %1174 = vmatpush3.bf16.msra.mxu1 %v1301_v20  ;;  %1064 = vmatprep.mubr.msk.f32.mxu1 %vm1233_vm0, %v1234_v16 }
 0x24c   :  { %1175 = vmatprep.subr.bf16.mxu1 %v1232_v7 }
 0x24f   :  { %1177 = vmatpush3.bf16.msra.mxu1 %v1319_v26 }
 0x250   :  { %1178 = vmatprep.subr.bf16.mxu1 %v1232_v7 }
 0x31d   :  { %v422_v4 = vpop.f32.mrb[4].mxu1 }
 0x31e   :  { %v426_v5 = vadd.f32 %v422_v4, %v173_v59  ;;  %v1055_v6 = vpop.f32.mrb[5].mxu1 }
 0x320   :  { %1219 = vtanh.f32 %v426_v5 }
 0x32a   :  { %v1220_v8 = vpop.eup %1219 }
 0x32b   :  { %1065 = vmatmul.mubr.msk.f32.vlgmr.msra.gmra.mrb[6].mxu1 %vm202_vm8, %v1220_v8 }
 0x32c   :  { %1180 = vmatpush3.bf16.msra.mxu1 %v1301_v20  ;;  %1075 = vmatprep.mubr.msk.f32.mxu1 %vm1233_vm0, %v1234_v16 }
 0x32d   :  { %1181 = vmatprep.subr.bf16.mxu1 %v1232_v7 }
 0x330   :  { %1183 = vmatpush3.bf16.msra.mxu1 %v1319_v26 }
 0x331   :  { %1190 = vmatprep.subr.bf16.mxu1 %v1232_v7 }
 0x3fe   :  { %v497_v9 = vpop.f32.mrb[6].mxu1 }
 0x3ff   :  { %v501_v10 = vadd.f32 %v1016_v58, %v497_v9  ;;  %v1066_v11 = vpop.f32.mrb[7].mxu1 }
 0x401   :  { %1221 = vtanh.f32 %v501_v10 }
 0x40b   :  { %v1222_v12 = vpop.eup %1221 }
 0x40c   :  { %1076 = vmatmul.mubr.msk.f32.vlgmr.msra.gmra.mrb[8].mxu1 %vm202_vm8, %v1222_v12 }
 0x40d   :  { %1192 = vmatpush3.bf16.msra.mxu1 %v1301_v20  ;;  %1097 = vmatprep.mubr.msk.f32.mxu1 %vm1233_vm0, %v1234_v16 }
 0x40e   :  { %1193 = vmatprep.subr.bf16.mxu1 %v1232_v7 }
 0x411   :  { %1195 = vmatpush3.bf16.msra.mxu1 %v1319_v26 }
 0x412   :  { %1202 = vmatprep.subr.bf16.mxu1 %v1232_v7 }
 0x4df   :  { %v572_v13 = vpop.f32.mrb[8].mxu1 }
 0x4e0   :  { %v576_v14 = vadd.f32 %v572_v13, %v183_v61  ;;  %v1077_v15 = vpop.f32.mrb[9].mxu1 }
 0x4e2   :  { %1223 = vtanh.f32 %v576_v14 }
 0x4ec   :  { %v1224_v17 = vpop.eup %1223 }
 0x4ed   :  { %1087 = vmatmul.mubr.msk.f32.vlgmr.msra.gmra.mrb[8].mxu0 %vm202_vm8, %v1224_v17 }
 0x4ee   :  { %1198 = vmatpush3.bf16.msra.mxu0 %v1301_v20  ;;  %1108 = vmatprep.mubr.msk.f32.mxu0 %vm1233_vm0, %v1234_v16 }
 0x4ef   :  { %1199 = vmatprep.subr.bf16.mxu0 %v1232_v7 }
 0x4f2   :  { %1201 = vmatpush3.bf16.msra.mxu0 %v1319_v26  ;;  %v34_v26 = vld [vmem:[%s1425_s2] sm:$0xff] }
 0x5c0   :  { %v647_v18 = vpop.f32.mrb[8].mxu0 }
 0x5c1   :  { %v651_v19 = vadd.f32 %v1019_v60, %v647_v18  ;;  %v1088_v21 = vpop.f32.mrb[9].mxu0 }
 0x5c3   :  { %1225 = vtanh.f32 %v651_v19 }
 0x5cd   :  { %v1226_v22 = vpop.eup %1225 }
 0x5ce   :  { %1098 = vmatmul.mubr.msk.f32.vlgmr.msra.gmra.mrb[10].mxu1 %vm202_vm8, %v1226_v22 }
 0x5cf   :  { %1119 = vmatprep.mubr.msk.f32.mxu1 %vm1233_vm0, %v1234_v16  ;;  %v1203_v16 = vpack.c.bf16 %v35_v27, %v34_v26 }
 0x5d1   :  { %1204 = vmatpush3.bf16.msra.mxu1 %v1203_v16 }
 0x5d2   :  { %1205 = vmatprep.subr.bf16.mxu1 %v1232_v7 }
 0x5d5   :  { %1207 = vmatpush3.bf16.msra.mxu1 %v1206_v30 }
 0x6a1   :  { %v722_v23 = vpop.f32.mrb[10].mxu1 }
 0x6a2   :  { %v726_v24 = vadd.f32 %v722_v23, %v193_v3  ;;  %v1099_v20 = vpop.f32.mrb[11].mxu1 }
 0x6a4   :  { %1227 = vtanh.f32 %v726_v24 }
 0x6ae   :  { %v1228_v25 = vpop.eup %1227 }
 0x6af   :  { %1109 = vmatmul.mubr.msk.f32.vlgmr.msra.gmra.mrb[10].mxu0 %vm202_vm8, %v1228_v25 }
 0x782   :  { %v797_v31 = vpop.f32.mrb[10].mxu0 }
 0x783   :  { %v801_v32 = vadd.f32 %v1022_v2, %v797_v31  ;;  %v1110_v33 = vpop.f32.mrb[11].mxu0 }
 0x785   :  { %1229 = vtanh.f32 %v801_v32 }
 0x78f   :  { %v1230_v34 = vpop.eup %1229 }
 0x790   :  { %1120 = vmatmul.mubr.msk.f32.vlgmr.msra.gmra.mrb[12].mxu1 %vm202_vm8, %v1230_v34 }
 0x863   :  { %v876_v36 = vpop.f32.mrb[12].mxu1 }
 0x864   :  { %v877_v37 = vadd.f32 %v908_v35, %v876_v36  ;;  %v1121_v38 = vpop.f32.mrb[13].mxu1 }
 0x866   :  { %880 = vst [vmem:[%s1426_s3] sm:$0xff] %v877_v37 }

</bundles_post_ra>
